<compile_context>
chip_gen: v7x
topology: tpu7x:2x2x1
jax: 0.10.0
libtpu: 0.0.40
codegen_flags: <defaults>
</compile_context>

<pallas_src>
import jax
import jax.numpy as jnp
from jax.experimental import pallas as pl
from jax.experimental.pallas import tpu as pltpu


def deep_model_kernel(x_ref, w_ref, b_ref, o_ref):
    # x_ref: [tb, D_in] in native dtype; w_ref: [D_in, D_out] f32; b_ref: [1, D_out] f32
    x = x_ref[...].astype(jnp.float32)                       # cast in-kernel (DMA stays narrow)
    y = jnp.dot(x, w_ref[...], preferred_element_type=jnp.float32)   # [tb, D_out]
    o_ref[...] = jnp.maximum(y + b_ref[...], 0.0).astype(o_ref.dtype)


def fold_params(w1, b1, w2, b2):
    """Weight-only folding of fc2(fc1(.)) — do this ONCE when weights are set,
    not per forward call."""
    w_fold = (w1.astype(jnp.float32) @ w2.astype(jnp.float32))                 # [D_in, D_out]
    b_fold = (b1.astype(jnp.float32) @ w2.astype(jnp.float32)
              + b2.astype(jnp.float32)).reshape(1, -1)                         # [1, D_out]
    return w_fold, b_fold


def _batch_tile(B, D_in, itemsize, vmem_budget_bytes=24 * 1024 * 1024):
    """Largest batch tile up to 1024 rows (multiple of 8) whose double-buffered
    input tiles stay comfortably under the scoped VMEM limit on any chip
    (v7x default scoped VMEM is 32 MiB; leave headroom)."""
    tb = min(B, 1024)
    tb = max(8, (tb // 8) * 8)
    max_rows = max(8, vmem_budget_bytes // (2 * D_in * itemsize))
    tb = min(tb, max(8, (max_rows // 8) * 8))
    return tb


def deep_model_forward(x, w_fold, b_fold):
    """x: [B, D_in] (any float dtype), w_fold: [D_in, D_out], b_fold: [1, D_out].
    Returns relu(x @ w_fold + b_fold).squeeze(), matching DeepModel.forward."""
    B, D_in = x.shape
    D_out = w_fold.shape[1]

    tb = _batch_tile(B, D_in, jnp.dtype(x.dtype).itemsize)
    grid = (pl.cdiv(B, tb),)  # ragged last block is fine: compute is row-wise independent

    out = pl.pallas_call(
        deep_model_kernel,
        out_shape=jax.ShapeDtypeStruct((B, D_out), x.dtype),
        grid=grid,
        in_specs=[
            pl.BlockSpec((tb, D_in), lambda i: (i, 0)),        # x tile, native dtype/layout
            pl.BlockSpec((D_in, D_out), lambda i: (0, 0)),     # folded weight (resident)
            pl.BlockSpec((1, D_out), lambda i: (0, 0)),        # folded bias (resident)
        ],
        out_specs=pl.BlockSpec((tb, D_out), lambda i: (i, 0)),
        compiler_params=pltpu.CompilerParams(
            dimension_semantics=("parallel",),                  # shards over 2 TCs on v7x
        ),
    )(x, w_fold, b_fold)

    # torch .squeeze(): drop all size-1 dims ((B, 1) -> (B,), and scalar if B == 1)
    return jnp.squeeze(out)


if __name__ == "__main__":
    # Small shapes consistent with DeepModel(D_in, H=20, D_out=1)
    B, D_in, H, D_out = 8, 32, 20, 1

    key = jax.random.PRNGKey(0)
    kx, kw1, kb1, kw2, kb2 = jax.random.split(key, 5)

    bound1 = 1.0 / (D_in ** 0.5)
    bound2 = 1.0 / (H ** 0.5)
    x = jax.random.normal(kx, (B, D_in), dtype=jnp.float32)
    w1 = jax.random.uniform(kw1, (D_in, H), jnp.float32, -bound1, bound1)
    b1 = jax.random.uniform(kb1, (H,), jnp.float32, -bound1, bound1)
    w2 = jax.random.uniform(kw2, (H, D_out), jnp.float32, -bound2, bound2)
    b2 = jax.random.uniform(kb2, (D_out,), jnp.float32, -bound2, bound2)

    # Fold once (out of the per-call path), then jit only the x-dependent forward.
    w_fold, b_fold = fold_params(w1, b1, w2, b2)
    fwd = jax.jit(deep_model_forward)

    y = fwd(x, w_fold, b_fold)
    y = jax.block_until_ready(y)

    # Reference in plain JAX (unfolded form; folding only changes f32 rounding order).
    ref = jnp.squeeze(jnp.maximum((x @ w1 + b1) @ w2 + b2, 0.0))
    assert y.shape == (B,), y.shape
    assert jnp.allclose(y, ref, atol=1e-5, rtol=1e-5)

    print("KERNEL_OK")
</pallas_src>

<mosaic_0001>
module attributes {stable_mosaic.version = 11 : i64} {
  func.func @deep_model_kernel(%arg0: i32, %arg1: memref<8x32xf32, #tpu.memory_space<vmem>>, %arg2: memref<32x1xf32, #tpu.memory_space<vmem>>, %arg3: memref<1x1xf32, #tpu.memory_space<vmem>>, %arg4: memref<8x1xf32, #tpu.memory_space<vmem>>) attributes {dimension_semantics = [#tpu.dimension_semantics<parallel>], iteration_bounds = array<i64: 1>, scalar_prefetch = 0 : i64, scratch_operands = 0 : i64, tpu.core_type = #tpu.core_type<tc>, window_params = [{transform_indices = @transform_0, window_bounds = array<i64: 8, 32>}, {pipeline_mode = #tpu.pipeline_mode<synchronous>, transform_indices = @transform_1, window_bounds = array<i64: 32, 1>}, {pipeline_mode = #tpu.pipeline_mode<synchronous>, transform_indices = @transform_2, window_bounds = array<i64: 1, 1>}, {transform_indices = @transform_3, window_bounds = array<i64: 8, 1>}]} {
    %c0 = arith.constant 0 : index
    %c0_0 = arith.constant 0 : index
    %0 = vector.load %arg1[%c0, %c0_0] : memref<8x32xf32, #tpu.memory_space<vmem>>, vector<8x32xf32>
    %c0_1 = arith.constant 0 : index
    %c0_2 = arith.constant 0 : index
    %1 = vector.load %arg2[%c0_1, %c0_2] : memref<32x1xf32, #tpu.memory_space<vmem>>, vector<32x1xf32>
    %cst = arith.constant dense<0.000000e+00> : vector<8x1xf32>
    %2 = tpu.matmul %0, %1, %cst {dimension_numbers = #tpu.dot_dimension_numbers<[1], [0], [0], [1], [0, 0, 1, 1], [], []>} : vector<8x32xf32>, vector<32x1xf32>, vector<8x1xf32> -> vector<8x1xf32>
    %c0_3 = arith.constant 0 : index
    %c0_4 = arith.constant 0 : index
    %3 = vector.load %arg3[%c0_3, %c0_4] : memref<1x1xf32, #tpu.memory_space<vmem>>, vector<1x1xf32>
    %4 = vector.broadcast %3 : vector<1x1xf32> to vector<8x1xf32>
    %5 = arith.addf %2, %4 : vector<8x1xf32>
    %cst_5 = arith.constant 0.000000e+00 : f32
    %6 = vector.broadcast %cst_5 : f32 to vector<8x1xf32>
    %7 = arith.maximumf %5, %6 : vector<8x1xf32>
    %c0_6 = arith.constant 0 : index
    %c0_7 = arith.constant 0 : index
    %8 = vector.load %arg4[%c0_6, %c0_7] : memref<8x1xf32, #tpu.memory_space<vmem>>, vector<8x1xf32>
    tpu.vector_store %arg4[%c0_6, %c0_7], %7 {strides = array<i32>} : memref<8x1xf32, #tpu.memory_space<vmem>>, vector<8x1xf32>,
    return
  }
  func.func @transform_0(%arg0: i32) -> (i32, i32) {
    %c0_i32 = arith.constant 0 : i32
    %c0_i32_0 = arith.constant 0 : i32
    return %arg0, %c0_i32 : i32, i32
  }
  func.func @transform_1(%arg0: i32) -> (i32, i32) {
    %c0_i32 = arith.constant 0 : i32
    %c0_i32_0 = arith.constant 0 : i32
    %c0_i32_1 = arith.constant 0 : i32
    return %c0_i32, %c0_i32_0 : i32, i32
  }
  func.func @transform_2(%arg0: i32) -> (i32, i32) {
    %c0_i32 = arith.constant 0 : i32
    %c0_i32_0 = arith.constant 0 : i32
    %c0_i32_1 = arith.constant 0 : i32
    return %c0_i32, %c0_i32_0 : i32, i32
  }
  func.func @transform_3(%arg0: i32) -> (i32, i32) {
    %c0_i32 = arith.constant 0 : i32
    %c0_i32_0 = arith.constant 0 : i32
    return %arg0, %c0_i32 : i32, i32
  }
}

</mosaic_0001>

<bundles_post_ra>
// kernel: deep_model_forward.1
= control target key start
LH: loop header
LB: loop body
LE: loop exit
PB: predicated region body
PF: predicated region fallthrough
CT: control target
= control target key end

     0   :  { %v136_v0 = vmov 0.0|0.0   ;;  %vm137_vm0 = vmmov 0   ;;  %v138_v4 = vmov 0.0   ;;  %vm28_vm1 = vcmask 261120   ;;  %s180_s1 = inlined_call_operand.vmem [shape: f32[32,1], index: 1, kind: input, shape index: {}]   ;;  %s181_s2 = inlined_call_operand.<no memory space> [shape: f32[1,1], index: 2, kind: input, shape index: {}]   ;;  %s182_s0 = inlined_call_operand.vmem [shape: f32[8,32], index: 0, kind: input, shape index: {}]   ;;  %s183_s3 = inlined_call_operand.vmem [shape: f32[8,1], index: 3, kind: output, shape index: {}]  }
   0x1   :  { %127 = vmatprep.subr.bf16.mxu0 %v136_v0  ;;  %v17_v1 = vld [vmem:[%s180_s1] sm:$0xff]  ;;  %v18_v2 = vld [vmem:[%s180_s1 + $0x8] sm:$0xff]  ;;  %v19_v3 = vld [vmem:[%s180_s1 + $0x10] sm:$0xff]  ;;  %124 = vmatprep.mubr.msk.f32.mxu0 %vm137_vm0, %v138_v4  ;;  %v8_v5 = vstv %s181_s2  ;;  %vm103_vm2 = vcmask 7168  }
   0x2   :  { %v128_v6 = vpack.c.bf16 %v18_v2, %v17_v1  ;;  %v20_v7 = vld [vmem:[%s180_s1 + $0x18] sm:$0xff]  ;;  %9 = vst [vmem:[#allocation2] sm:$0x1] %v8_v5  ;;  %v16_v9 = vld [vmem:[%s182_s0] sm:$0xff] }
   0x3   :  { %v131_v8 = vpack.c.bf16 %v20_v7, %v19_v3 }
   0x4   :  { %129 = vmatpush3.bf16.msra.mxu0 %v128_v6 }
   0x5   :  { %130 = vmatprep.subr.bf16.mxu0 %v136_v0 }
   0x8   :  { %132 = vmatpush3.bf16.msra.mxu0 %v131_v8 }
   0x9   :  { %v109_v10 = vld [vmem:[#allocation2] ss:$0 sm:$0xff] }
   0xb   :  { %125 = vmatmul.mubr.msk.f32.vlgmr.msra.gmra.mrb[0].mxu0 %vm28_vm1, %v16_v9 }
  0xde   :  { %v98_v11 = vpop.f32.mrb[0].mxu0 }
  0xdf   :  { %v99_v12 = vadd.f32 %v109_v10, %v98_v11  ;;  %v126_v13 = vpop.f32.mrb[1].mxu0 }
  0xe1   :  { %v102_v14 = vmax.f32 %v99_v12, 0.0 }
  0xe3   :  { %104 = vst.msk [vmem:[%s183_s3] sm:$0xff] %vm103_vm2, %v102_v14 }

</bundles_post_ra>
